<compile_context>
chip_gen: v5e
topology: v5e:2x2
jax: 0.10.0
libtpu: 0.0.40
codegen_flags: <defaults>
</compile_context>

<pallas_src>
import functools

import jax
import jax.numpy as jnp
from jax.experimental import pallas as pl
from jax.experimental.pallas import tpu as pltpu

_LANE = 128


def _round_up(x, m):
    return ((x + m - 1) // m) * m


def _vmem_capacity_bytes():
    try:
        cap = getattr(pltpu.get_tpu_info(), "vmem_capacity_bytes", None)
        if cap:
            return int(cap)
    except Exception:
        pass
    return 64 * 1024 * 1024  # conservative fallback (v7x per-TC VMEM)


def _residual_tanh_kernel(x_ref, w_ref, b_ref, o_ref, *, tn):
    """One (TM, TN) output tile: out = tanh(x @ Wt + b) + x[:, cols].

    x_ref: (TM, D) row tile, VMEM-resident across the feature-tile (j) axis.
    w_ref: (D, TN) weight tile in (in, out) layout -> native MXU (K, N).
    b_ref: (1, TN) bias tile (f32).
    """
    x = x_ref[...]                                                   # (TM, D)
    y = jnp.dot(x, w_ref[...], preferred_element_type=jnp.float32)  # (TM, TN) MXU
    y = jnp.tanh(y + b_ref[...].astype(jnp.float32))                 # bias + tanh (EUP)
    if tn == x_ref.shape[1]:
        x_res = x                                                    # whole-width tile
    else:
        j = pl.program_id(1)
        col0 = pl.multiple_of(j * tn, _LANE)
        x_res = x_ref[:, pl.ds(col0, tn)]                            # residual slice
    o_ref[...] = (y + x_res.astype(jnp.float32)).astype(o_ref.dtype)


def residual_tanh_layer(x, W, b, *, row_tile=512, compute_dtype=None,
                        out_dtype=None):
    """ResidualTanhLayer forward: tanh(x @ W.T + b) + x.

    x: (n, dims) or (dims,); W: (dims, dims) in PyTorch (out, in) layout; b: (dims,).
    compute_dtype: optionally cast x/W (e.g. jnp.bfloat16) to halve HBM reads;
    accumulation / bias / tanh / residual math remain f32 in-kernel (but the
    residual input itself is then bf16-rounded).  out_dtype defaults to x.dtype.
    """
    squeeze = x.ndim == 1
    if squeeze:
        x = x[None, :]
    n, dims = x.shape
    assert W.shape == (dims, dims) and b.shape == (dims,)

    out_dtype = jnp.dtype(out_dtype) if out_dtype is not None else x.dtype
    in_dtype = jnp.dtype(compute_dtype) if compute_dtype is not None else x.dtype
    in_isz = jnp.dtype(in_dtype).itemsize
    out_isz = jnp.dtype(out_dtype).itemsize

    # Minimal alignment: lanes to 128, rows to the sublane packing of in_dtype.
    row_mult = max(8, 32 // in_isz)          # 8 (f32) / 16 (bf16) / 32 (int8/fp8)
    d_pad = _round_up(max(dims, _LANE), _LANE)
    n_pad = _round_up(n, row_mult)

    # --- tile selection under the per-core VMEM budget ----------------------
    vmem_budget = int(_vmem_capacity_bytes() * 0.85)   # ~15% compiler headroom

    def vmem_bytes(tm, tn):
        return (2 * tm * d_pad * in_isz        # x row tile (double-buffered)
                + 2 * d_pad * tn * in_isz      # weight tile (double-buffered)
                + 2 * tm * tn * out_isz        # out tile (double-buffered)
                + 2 * 8 * tn * 4)              # bias (sublane-padded)

    tm = max(row_mult, _round_up(min(row_tile, n_pad), row_mult))
    tn = d_pad
    # Prefer shrinking the row tile first (keeps W resident -> read once) ...
    while vmem_bytes(tm, tn) > vmem_budget and tm > 128:
        tm = max(128, _round_up(tm // 2, row_mult))
    # ... then tile W's output-feature dim.  TN must divide d_pad so there are
    # no ragged column blocks (and no OOB residual slice of the resident x).
    if vmem_bytes(tm, tn) > vmem_budget:
        lanes = d_pad // _LANE
        for t in sorted((t for t in range(1, lanes + 1) if lanes % t == 0),
                        reverse=True):
            tn = t * _LANE
            if vmem_bytes(tm, tn) <= vmem_budget:
                break
    while vmem_bytes(tm, tn) > vmem_budget and tm > row_mult:
        tm = max(row_mult, _round_up(tm // 2, row_mult))

    # --- operand preparation (fast path: no pad / copy at all) --------------
    if n_pad == n and d_pad == dims and in_dtype == x.dtype:
        xp = x
    else:
        xp = jnp.zeros((n_pad, d_pad), in_dtype).at[:n, :dims].set(
            x.astype(in_dtype))
    # Weight transpose folded into the wrapper: kernel sees (in, out) = (K, N).
    if d_pad == dims:
        Wt = W.T.astype(in_dtype)
        bp = b.astype(jnp.float32).reshape(1, dims)
    else:
        Wt = jnp.zeros((d_pad, d_pad), in_dtype).at[:dims, :dims].set(
            W.T.astype(in_dtype))
        bp = jnp.zeros((1, d_pad), jnp.float32).at[0, :dims].set(
            b.astype(jnp.float32))

    grid = (pl.cdiv(n_pad, tm), d_pad // tn)
    w_reads = 1 if tn == d_pad else grid[0]   # resident W is fetched only once

    cost = pl.CostEstimate(
        flops=2 * n_pad * d_pad * d_pad,
        transcendentals=n_pad * d_pad,
        bytes_accessed=(n_pad * d_pad * in_isz            # x read
                        + w_reads * d_pad * d_pad * in_isz  # W read(s)
                        + d_pad * 4                         # bias read
                        + n_pad * d_pad * out_isz),         # out write
    )

    out = pl.pallas_call(
        functools.partial(_residual_tanh_kernel, tn=tn),
        out_shape=jax.ShapeDtypeStruct((n_pad, d_pad), out_dtype),
        grid=grid,
        in_specs=[
            pl.BlockSpec((tm, d_pad), lambda i, j: (i, 0)),   # x: resident over j
            pl.BlockSpec((d_pad, tn), lambda i, j: (0, j)),   # W.T: (K, N) tiles
            pl.BlockSpec((1, tn), lambda i, j: (0, j)),       # bias tiles
        ],
        out_specs=pl.BlockSpec((tm, tn), lambda i, j: (i, j)),
        compiler_params=pltpu.CompilerParams(
            dimension_semantics=("parallel", "arbitrary"),
            vmem_limit_bytes=vmem_budget,
        ),
        cost_estimate=cost,
    )(xp, Wt, bp)

    if n_pad != n or d_pad != dims:
        out = out[:n, :dims]
    if squeeze:
        out = out[0]
    return out


if __name__ == "__main__":
    key = jax.random.PRNGKey(0)
    k_w, k_b, k_x = jax.random.split(key, 3)

    dims, n = 32, 8

    # Deterministic parameter init matching torch.nn.init.normal_(std=0.01)
    W = 0.01 * jax.random.normal(k_w, (dims, dims), dtype=jnp.float32)
    b = 0.01 * jax.random.normal(k_b, (dims,), dtype=jnp.float32)
    x = jax.random.normal(k_x, (n, dims), dtype=jnp.float32)

    out = jax.block_until_ready(residual_tanh_layer(x, W, b))

    # Pure-JAX reference: torch.tanh(bmv(W, x) + b) + x == tanh(x @ W.T + b) + x
    ref = jnp.tanh(x @ W.T + b) + x
    assert out.shape == (n, dims)
    assert jnp.allclose(out, ref, atol=1e-5, rtol=1e-5)

    # Single-vector path (dims,) -> (dims,)
    v = x[0]
    out_v = jax.block_until_ready(residual_tanh_layer(v, W, b))
    assert out_v.shape == (dims,)
    assert jnp.allclose(out_v, ref[0], atol=1e-5, rtol=1e-5)

    # Aligned fast path (dims % 128 == 0, n % 8 == 0): no pad / copy / slice.
    d2, n2 = 128, 16
    k_w2, k_b2, k_x2 = jax.random.split(jax.random.PRNGKey(0), 3)
    W2 = 0.01 * jax.random.normal(k_w2, (d2, d2), dtype=jnp.float32)
    b2 = 0.01 * jax.random.normal(k_b2, (d2,), dtype=jnp.float32)
    x2 = jax.random.normal(k_x2, (n2, d2), dtype=jnp.float32)
    out2 = jax.block_until_ready(residual_tanh_layer(x2, W2, b2))
    ref2 = jnp.tanh(x2 @ W2.T + b2) + x2
    assert out2.shape == (n2, d2)
    assert jnp.allclose(out2, ref2, atol=1e-5, rtol=1e-5)

    print("KERNEL_OK")
</pallas_src>

<mosaic_0001>
module attributes {stable_mosaic.version = 11 : i64} {
  func.func @_residual_tanh_kernel(%arg0: i32, %arg1: i32, %arg2: memref<8x128xf32, #tpu.memory_space<vmem>>, %arg3: memref<128x128xf32, #tpu.memory_space<vmem>>, %arg4: memref<1x128xf32, #tpu.memory_space<vmem>>, %arg5: memref<8x128xf32, #tpu.memory_space<vmem>>) attributes {dimension_semantics = [#tpu.dimension_semantics<parallel>, #tpu.dimension_semantics<arbitrary>], iteration_bounds = array<i64: 1, 1>, scalar_prefetch = 0 : i64, scratch_operands = 0 : i64, tpu.core_type = #tpu.core_type<tc>, window_params = [{transform_indices = @transform_0, window_bounds = array<i64: 8, 128>}, {transform_indices = @transform_1, window_bounds = array<i64: 128, 128>}, {transform_indices = @transform_2, window_bounds = array<i64: 1, 128>}, {transform_indices = @transform_3, window_bounds = array<i64: 8, 128>}]} {
    %c0 = arith.constant 0 : index
    %c0_0 = arith.constant 0 : index
    %0 = vector.load %arg2[%c0, %c0_0] : memref<8x128xf32, #tpu.memory_space<vmem>>, vector<8x128xf32>
    %c0_1 = arith.constant 0 : index
    %c0_2 = arith.constant 0 : index
    %1 = vector.load %arg3[%c0_1, %c0_2] : memref<128x128xf32, #tpu.memory_space<vmem>>, vector<128x128xf32>
    %cst = arith.constant dense<0.000000e+00> : vector<8x128xf32>
    %2 = tpu.matmul %0, %1, %cst {dimension_numbers = #tpu.dot_dimension_numbers<[1], [0], [0], [1], [0, 0, 1, 1], [], []>} : vector<8x128xf32>, vector<128x128xf32>, vector<8x128xf32> -> vector<8x128xf32>
    %c0_3 = arith.constant 0 : index
    %c0_4 = arith.constant 0 : index
    %3 = vector.load %arg4[%c0_3, %c0_4] : memref<1x128xf32, #tpu.memory_space<vmem>>, vector<1x128xf32>
    %4 = vector.broadcast %3 : vector<1x128xf32> to vector<8x128xf32>
    %5 = arith.addf %2, %4 : vector<8x128xf32>
    %6 = math.tanh %5 : vector<8x128xf32>
    %7 = arith.addf %6, %0 : vector<8x128xf32>
    %c0_5 = arith.constant 0 : index
    %c0_6 = arith.constant 0 : index
    %8 = vector.load %arg5[%c0_5, %c0_6] : memref<8x128xf32, #tpu.memory_space<vmem>>, vector<8x128xf32>
    tpu.vector_store %arg5[%c0_5, %c0_6], %7 {strides = array<i32>} : memref<8x128xf32, #tpu.memory_space<vmem>>, vector<8x128xf32>,
    return
  }
  func.func @transform_0(%arg0: i32, %arg1: i32) -> (i32, i32) {
    %c0_i32 = arith.constant 0 : i32
    %c0_i32_0 = arith.constant 0 : i32
    return %arg0, %c0_i32 : i32, i32
  }
  func.func @transform_1(%arg0: i32, %arg1: i32) -> (i32, i32) {
    %c0_i32 = arith.constant 0 : i32
    %c0_i32_0 = arith.constant 0 : i32
    return %c0_i32, %arg1 : i32, i32
  }
  func.func @transform_2(%arg0: i32, %arg1: i32) -> (i32, i32) {
    %c0_i32 = arith.constant 0 : i32
    %c0_i32_0 = arith.constant 0 : i32
    return %c0_i32, %arg1 : i32, i32
  }
  func.func @transform_3(%arg0: i32, %arg1: i32) -> (i32, i32) {
    %c0_i32 = arith.constant 0 : i32
    return %arg0, %arg1 : i32, i32
  }
}

</mosaic_0001>

<bundles_post_ra>
// kernel: tpu_custom_call.1
= control target key start
LH: loop header
LB: loop body
LE: loop exit
PB: predicated region body
PF: predicated region fallthrough
CT: control target
= control target key end

     0   :  { %8 = vsyncpa [#allocation3], 0  ;;  %s230_s0 = inlined_call_operand.hbm [shape: f32[8,128], index: 0, kind: input, shape index: {}]   ;;  %s231_s1 = inlined_call_operand.hbm [shape: f32[128,128], index: 1, kind: input, shape index: {}]   ;;  %s232_s2 = inlined_call_operand.vmem [shape: f32[1,128], index: 2, kind: input, shape index: {}]   ;;  %s233_s3 = inlined_call_operand.hbm [shape: f32[8,128], index: 3, kind: output, shape index: {}]  }
   0x1   :  { %9 = vsyncpa [#allocation6], 0 }
   0x2   :  { %10 = vsyncpa [#allocation4], 0  ;;  %s16_s14 = sshll.u32 %s230_s0, 4  ;;  %s193_s15 = smov [#allocation2]   ;;  %s17_s14 = int_to_ptr.hbm [resolvable:$true] %s16_s14 }
   0x3   :  { %s18_s16 = sshll.u32 %s193_s15, 4  ;;  %s26_s19 = sshll.u32 %s231_s1, 4  ;;  %s19_s16 = int_to_ptr.vmem [resolvable:$true] %s18_s16  ;;  %s27_s19 = int_to_ptr.hbm [resolvable:$true] %s26_s19 }
   0x4   :  { %21 = dma.hbm_to_vmem [thread:$0]  %s17_s14, 128, %s19_s16, [#allocation3]  }
   0x5   :  { %s194_s20 = smov [#allocation5]   ;;  %s195_s22 = smov 128  }
   0x6   :  { %s28_s21 = sshll.u32 %s194_s20, 4  ;;  %s196_s23 = smov 8   ;;  %s29_s21 = int_to_ptr.vmem [resolvable:$true] %s28_s21 }
   0x7   :  { %34 = dma.hbm_to_vmem [thread:$0]  %s27_s19, 2048, %s29_s21, [#allocation6], %s195_s22, %s195_s22, %s196_s23  }
   0x8   :  { %187 = dma.done.wait [#allocation3], 128  }
   0x9   :  { %188 = vsyncadd [#allocation3], 4294967168 }
   0xa   :  { %189 = dma.done.wait [#allocation6], 2048  }
   0xb   :  { %190 = vsyncadd [#allocation6], 4294965248  ;;  %v61_v0 = vld [vmem:[#allocation5 + $0x78] sm:$0xff]  ;;  %v60_v1 = vld [vmem:[#allocation5 + $0x70] sm:$0xff]  ;;  %s197_s24 = smov [#allocation7]   ;;  %s96_s28 = sshll.u32 %s233_s3, 4  ;;  %s97_s28 = int_to_ptr.hbm [resolvable:$true] %s96_s28 }
   0xc   :  { %66 = vmatpush.msra.mxu0 %v61_v0  ;;  %v59_v2 = vld [vmem:[#allocation5 + $0x68] sm:$0xff]  ;;  %v58_v3 = vld [vmem:[#allocation5 + $0x60] sm:$0xff]  ;;  %v57_v4 = vld [vmem:[#allocation5 + $0x58] sm:$0xff]  ;;  %s94_s25 = sshll.u32 %s197_s24, 4  ;;  %s95_s25 = int_to_ptr.vmem [resolvable:$true] %s94_s25 }
   0xd   :  { %v56_v5 = vld [vmem:[#allocation5 + $0x50] sm:$0xff]  ;;  %v55_v6 = vld [vmem:[#allocation5 + $0x48] sm:$0xff]  ;;  %v54_v7 = vld [vmem:[#allocation5 + $0x40] sm:$0xff] }
   0xe   :  { %67 = vmatpush.msra.mxu0 %v60_v1  ;;  %v53_v8 = vld [vmem:[#allocation5 + $0x38] sm:$0xff]  ;;  %v52_v9 = vld [vmem:[#allocation5 + $0x30] sm:$0xff]  ;;  %v51_v10 = vld [vmem:[#allocation5 + $0x28] sm:$0xff] }
   0xf   :  { %v50_v11 = vld [vmem:[#allocation5 + $0x20] sm:$0xff]  ;;  %v49_v12 = vld [vmem:[#allocation5 + $0x18] sm:$0xff]  ;;  %v48_v13 = vld [vmem:[#allocation5 + $0x10] sm:$0xff] }
  0x10   :  { %68 = vmatpush.msra.mxu0 %v59_v2  ;;  %v47_v14 = vld [vmem:[#allocation5 + $0x8] sm:$0xff]  ;;  %v46_v15 = vld [vmem:[#allocation5] sm:$0xff]  ;;  %v45_v16 = vld [vmem:[#allocation2] sm:$0xff] }
  0x11   :  { %v112_v17 = vld [vmem:[%s232_s2] ss:$0 sm:$0xff] }
  0x12   :  { %69 = vmatpush.msra.mxu0 %v58_v3 }
  0x14   :  { %70 = vmatpush.msra.mxu0 %v57_v4 }
  0x16   :  { %71 = vmatpush.msra.mxu0 %v56_v5 }
  0x18   :  { %72 = vmatpush.msra.mxu0 %v55_v6 }
  0x1a   :  { %73 = vmatpush.msra.mxu0 %v54_v7 }
  0x1c   :  { %74 = vmatpush.msra.mxu0 %v53_v8 }
  0x1e   :  { %75 = vmatpush.msra.mxu0 %v52_v9 }
  0x20   :  { %76 = vmatpush.msra.mxu0 %v51_v10 }
  0x22   :  { %77 = vmatpush.msra.mxu0 %v50_v11 }
  0x24   :  { %78 = vmatpush.msra.mxu0 %v49_v12 }
  0x26   :  { %79 = vmatpush.msra.mxu0 %v48_v13 }
  0x28   :  { %80 = vmatpush.msra.mxu0 %v47_v14 }
  0x2a   :  { %81 = vmatpush.msra.mxu0 %v46_v15 }
  0x2b   :  { %82 = vmatmul.f32.vlgmr.msra.gmra.mxu0 %v45_v16 }
  0xa8   :  { %v83_v18 = vpop.f32.mrf.mxu0 }
  0xa9   :  { %v84_v19 = vadd.f32 %v112_v17, %v83_v18 }
  0xab   :  { %113 = vtanh.f32 %v84_v19 }
  0xb1   :  { %v114_v20 = vpop.eup %113 }
  0xb2   :  { %v87_v21 = vadd.f32 %v114_v20, %v45_v16 }
  0xb4   :  { %88 = vst [vmem:[#allocation7] sm:$0xff] %v87_v21 }
  0xb5   :  { %99 = dma.vmem_to_hbm [thread:$0]  %s95_s25, 128, %s97_s28, [#allocation4]  }
  0xb6   :  { %191 = dma.done.wait [#allocation4], 128  }
  0xb7   :  { %192 = vsyncadd [#allocation4], 4294967168 }
  0xb8   :  { %104 = vsyncpa [#allocation3], 1 }
  0xb9   :  { %105 = vsyncpa [#allocation6], 1 }
  0xba   :  { %106 = vsyncpa [#allocation4], 1 }

</bundles_post_ra>
